<compile_context>
chip_gen: v7x
topology: tpu7x:2x2x1
jax: 0.10.0
libtpu: 0.0.40
codegen_flags: <defaults>
</compile_context>

<pallas_src>
import jax
import jax.numpy as jnp
from jax import lax
from jax.experimental import pallas as pl
from jax.experimental.pallas import tpu as pltpu


def net_kernel(ids_ref, wf_ref, b1_ref, w2_ref, b2_ref, out_ref):
    ids = ids_ref[...]                                   # (La, Bt) int32
    La, Bt = ids.shape
    Pk = wf_ref.shape[1]                                 # padded contraction dim

    # One-hot counts, transposed: counts[p, b] = #{l : ids[l, b] == p}.
    # Rows P+1..Pk-1 never match (ids < P+1) and the matching weight columns
    # are zero.  La is small & static -> unrolled VPU compares; int32
    # accumulation with one cast at the end.
    iota_p = lax.broadcasted_iota(jnp.int32, (Pk, Bt), 0)          # hoisted once
    counts = jnp.zeros((Pk, Bt), jnp.int32)
    for l in range(La):
        counts = counts + (ids[l:l + 1, :] == iota_p).astype(jnp.int32)
    counts_f = counts.astype(jnp.float32)                          # single cast

    # fc1 with the embedding table AND the home/away column folded in:
    #   h^T = W_f @ counts^T + b1        (H, Bt), single MXU matmul
    h = jnp.dot(wf_ref[...], counts_f, preferred_element_type=jnp.float32)
    h = jnp.maximum(h + b1_ref[...], 0.0)                          # bias + ReLU

    # fc2:  out^T = W2 @ h^T + b2   -- lane-dense (O, Bt), no output padding.
    out_ref[...] = (jnp.dot(w2_ref[...], h, preferred_element_type=jnp.float32)
                    + b2_ref[...]).astype(out_ref.dtype)


def net_forward(lineup, emb_table, w1, b1, w2, b2, *, block_b=512):
    """lineup: (B, L+1) int32 (last column is the 0/1 home flag).
       Weights in PyTorch convention:
       emb_table (P, E), w1 (H, E+1), b1 (H,), w2 (O, H), b2 (O,)."""
    B = lineup.shape[0]
    L = lineup.shape[1] - 1
    P, E = emb_table.shape
    H = w1.shape[0]
    O = w2.shape[0]

    # ---- Inputs ----
    ids = lineup[:, :-1].astype(jnp.int32)                         # (B, L)
    home = lineup[:, -1].astype(jnp.int32)                         # (B,)
    # Fold the home/away flag into the one-hot/fc1 matmul: flag==1 -> virtual
    # id P (row P of the fused weight holds w1's home column); flag==0 -> id 0,
    # which hits the all-zero padding row.  Assumes the flag is {0,1}.
    home_id = jnp.where(home > 0, jnp.int32(P), jnp.int32(0))
    ids_aug = jnp.concatenate([ids, home_id[:, None]], axis=1)     # (B, L+1)
    La = L + 1

    # ---- Weight prep (plain JAX glue, once per call; kept in f32 — exact fold) ----
    w1_t = w1.T                                                    # (E+1, H)
    fused = jnp.concatenate(
        [emb_table.astype(jnp.float32) @ w1_t[:E, :],              # (P, H)
         w1_t[E:E + 1, :].astype(jnp.float32)],                    # home column
        axis=0)                                                    # (P+1, H)
    Pk = pl.cdiv(P + 1, 8) * 8                                     # sublane-pad K dim
    wf = jnp.zeros((H, Pk), jnp.float32).at[:, :P + 1].set(fused.T)   # (H, Pk)
    b1_c = b1.reshape(H, 1).astype(jnp.float32)                    # (H, 1)
    w2_f = w2.astype(jnp.float32)                                  # (O, H)
    b2_c = b2.reshape(O, 1).astype(jnp.float32)                    # (O, 1)

    # ---- Batch tiling: batch is the lane dimension, no output padding ----
    B128 = pl.cdiv(B, 128) * 128
    block_b = max(128, min(block_b, B128) // 128 * 128)
    # Keep a few grid steps so BlockSpec pipelining / megacore sharding (v7x
    # has 2 TCs) has work to overlap, without shrinking tiles below 128 lanes.
    while block_b > 128 and B128 // block_b < 4:
        block_b = max(128, (block_b // 2) // 128 * 128)
    B_pad = pl.cdiv(B, block_b) * block_b
    if B_pad != B:
        # Padded columns get id 0 everywhere -> hit the zero row of the fused
        # weight (padding_idx contract); they are sliced off below anyway.
        ids_aug = jnp.pad(ids_aug, ((0, B_pad - B), (0, 0)))
    ids_t = ids_aug.T                                              # (La, B_pad)
    grid = (B_pad // block_b,)

    out_t = pl.pallas_call(
        net_kernel,
        out_shape=jax.ShapeDtypeStruct((O, B_pad), jnp.float32),
        grid_spec=pltpu.PrefetchScalarGridSpec(
            num_scalar_prefetch=0,
            grid=grid,
            in_specs=[
                pl.BlockSpec((La, block_b), lambda i: (0, i)),     # ids   (batch-tiled)
                pl.BlockSpec((H, Pk), lambda i: (0, 0)),           # fused fc1 weight
                pl.BlockSpec((H, 1), lambda i: (0, 0)),            # b1    (resident)
                pl.BlockSpec((O, H), lambda i: (0, 0)),            # w2    (resident)
                pl.BlockSpec((O, 1), lambda i: (0, 0)),            # b2    (resident)
            ],
            out_specs=pl.BlockSpec((O, block_b), lambda i: (0, i)),
        ),
        compiler_params=pltpu.CompilerParams(
            dimension_semantics=("parallel",)),
    )(ids_t, wf, b1_c, w2_f, b2_c)

    return out_t[:, :B].T                                          # (B, O)


def net_forward_ref(lineup, emb_table, w1, b1, w2, b2):
    """Pure-JAX f32 reference mirroring the PyTorch forward exactly."""
    ids = lineup[:, :-1]
    home = lineup[:, -1:].astype(jnp.float32)
    emb = jnp.take(emb_table, ids, axis=0)          # (B, L, E)
    emb_sum = emb.sum(axis=1)                       # (B, E)
    combined = jnp.concatenate([emb_sum, home], axis=-1)
    x = combined @ w1.T + b1
    x = jnp.maximum(x, 0.0)
    return x @ w2.T + b2


if __name__ == "__main__":
    # Small, deterministic setup.
    num_players, embedding_dim, hidden_size, output_size = 32, 16, 32, 4
    batch, lineup_len = 256, 5                      # lineup tensor is (256, 6)

    key = jax.random.PRNGKey(0)
    k_emb, k_w1, k_b1, k_w2, k_b2, k_ids, k_home = jax.random.split(key, 7)

    emb_table = jax.random.normal(k_emb, (num_players, embedding_dim), jnp.float32) * 0.1
    emb_table = emb_table.at[0].set(0.0)            # padding_idx=0

    w1 = jax.random.normal(k_w1, (hidden_size, embedding_dim + 1), jnp.float32) * 0.1
    b1 = jax.random.normal(k_b1, (hidden_size,), jnp.float32) * 0.1
    w2 = jax.random.normal(k_w2, (output_size, hidden_size), jnp.float32) * 0.1
    b2 = jax.random.normal(k_b2, (output_size,), jnp.float32) * 0.1

    ids = jax.random.randint(k_ids, (batch, lineup_len), 0, num_players, jnp.int32)
    home = jax.random.randint(k_home, (batch, 1), 0, 2, jnp.int32)
    lineup = jnp.concatenate([ids, home], axis=1)   # (B, L+1) int32

    out = net_forward(lineup, emb_table, w1, b1, w2, b2)
    out = jax.block_until_ready(out)

    ref = net_forward_ref(lineup, emb_table, w1, b1, w2, b2)
    assert out.shape == (batch, output_size)
    # f32 matmuls with the embedding fold reassociated -> tight tolerance is fine.
    assert jnp.allclose(out, ref, atol=1e-2, rtol=1e-2), (
        "mismatch vs reference: max abs diff = "
        f"{jnp.max(jnp.abs(out - ref))}")

    print("KERNEL_OK")
</pallas_src>

<mosaic_0001>
module attributes {stable_mosaic.version = 11 : i64} {
  func.func @net_kernel(%arg0: i32, %arg1: memref<6x128xi32, #tpu.memory_space<vmem>>, %arg2: memref<32x40xf32, #tpu.memory_space<vmem>>, %arg3: memref<32x1xf32, #tpu.memory_space<vmem>>, %arg4: memref<4x32xf32, #tpu.memory_space<vmem>>, %arg5: memref<4x1xf32, #tpu.memory_space<vmem>>, %arg6: memref<4x128xf32, #tpu.memory_space<vmem>>) attributes {dimension_semantics = [#tpu.dimension_semantics<parallel>], iteration_bounds = array<i64: 2>, scalar_prefetch = 0 : i64, scratch_operands = 0 : i64, tpu.core_type = #tpu.core_type<tc>, window_params = [{transform_indices = @transform_0, window_bounds = array<i64: 6, 128>}, {pipeline_mode = #tpu.pipeline_mode<synchronous>, transform_indices = @transform_1, window_bounds = array<i64: 32, 40>}, {pipeline_mode = #tpu.pipeline_mode<synchronous>, transform_indices = @transform_2, window_bounds = array<i64: 32, 1>}, {pipeline_mode = #tpu.pipeline_mode<synchronous>, transform_indices = @transform_3, window_bounds = array<i64: 4, 32>}, {pipeline_mode = #tpu.pipeline_mode<synchronous>, transform_indices = @transform_4, window_bounds = array<i64: 4, 1>}, {transform_indices = @transform_5, window_bounds = array<i64: 4, 128>}]} {
    %c0 = arith.constant 0 : index
    %c0_0 = arith.constant 0 : index
    %0 = vector.load %arg1[%c0, %c0_0] : memref<6x128xi32, #tpu.memory_space<vmem>>, vector<6x128xi32>
    %1 = tpu.iota {dimensions = array<i32: 0>} : vector<40x128xi32>
    %c0_i32 = arith.constant 0 : i32
    %2 = vector.broadcast %c0_i32 : i32 to vector<40x128xi32>
    %3 = vector.extract_strided_slice %0 {offsets = [0, 0], sizes = [1, 128], strides = [1, 1]} : vector<6x128xi32> to vector<1x128xi32>
    %4 = vector.broadcast %3 : vector<1x128xi32> to vector<40x128xi32>
    %5 = arith.cmpi eq, %4, %1 : vector<40x128xi32>
    %6 = arith.extui %5 : vector<40x128xi1> to vector<40x128xi32>
    %7 = arith.addi %2, %6 : vector<40x128xi32>
    %8 = vector.extract_strided_slice %0 {offsets = [1, 0], sizes = [1, 128], strides = [1, 1]} : vector<6x128xi32> to vector<1x128xi32>
    %9 = vector.broadcast %8 : vector<1x128xi32> to vector<40x128xi32>
    %10 = arith.cmpi eq, %9, %1 : vector<40x128xi32>
    %11 = arith.extui %10 : vector<40x128xi1> to vector<40x128xi32>
    %12 = arith.addi %7, %11 : vector<40x128xi32>
    %13 = vector.extract_strided_slice %0 {offsets = [2, 0], sizes = [1, 128], strides = [1, 1]} : vector<6x128xi32> to vector<1x128xi32>
    %14 = vector.broadcast %13 : vector<1x128xi32> to vector<40x128xi32>
    %15 = arith.cmpi eq, %14, %1 : vector<40x128xi32>
    %16 = arith.extui %15 : vector<40x128xi1> to vector<40x128xi32>
    %17 = arith.addi %12, %16 : vector<40x128xi32>
    %18 = vector.extract_strided_slice %0 {offsets = [3, 0], sizes = [1, 128], strides = [1, 1]} : vector<6x128xi32> to vector<1x128xi32>
    %19 = vector.broadcast %18 : vector<1x128xi32> to vector<40x128xi32>
    %20 = arith.cmpi eq, %19, %1 : vector<40x128xi32>
    %21 = arith.extui %20 : vector<40x128xi1> to vector<40x128xi32>
    %22 = arith.addi %17, %21 : vector<40x128xi32>
    %23 = vector.extract_strided_slice %0 {offsets = [4, 0], sizes = [1, 128], strides = [1, 1]} : vector<6x128xi32> to vector<1x128xi32>
    %24 = vector.broadcast %23 : vector<1x128xi32> to vector<40x128xi32>
    %25 = arith.cmpi eq, %24, %1 : vector<40x128xi32>
    %26 = arith.extui %25 : vector<40x128xi1> to vector<40x128xi32>
    %27 = arith.addi %22, %26 : vector<40x128xi32>
    %28 = vector.extract_strided_slice %0 {offsets = [5, 0], sizes = [1, 128], strides = [1, 1]} : vector<6x128xi32> to vector<1x128xi32>
    %29 = vector.broadcast %28 : vector<1x128xi32> to vector<40x128xi32>
    %30 = arith.cmpi eq, %29, %1 : vector<40x128xi32>
    %31 = arith.extui %30 : vector<40x128xi1> to vector<40x128xi32>
    %32 = arith.addi %27, %31 : vector<40x128xi32>
    %33 = arith.sitofp %32 : vector<40x128xi32> to vector<40x128xf32>
    %c0_1 = arith.constant 0 : index
    %c0_2 = arith.constant 0 : index
    %34 = vector.load %arg2[%c0_1, %c0_2] : memref<32x40xf32, #tpu.memory_space<vmem>>, vector<32x40xf32>
    %cst = arith.constant dense<0.000000e+00> : vector<32x128xf32>
    %35 = tpu.matmul %34, %33, %cst {dimension_numbers = #tpu.dot_dimension_numbers<[1], [0], [0], [1], [0, 0, 1, 1], [], []>} : vector<32x40xf32>, vector<40x128xf32>, vector<32x128xf32> -> vector<32x128xf32>
    %c0_3 = arith.constant 0 : index
    %c0_4 = arith.constant 0 : index
    %36 = vector.load %arg3[%c0_3, %c0_4] : memref<32x1xf32, #tpu.memory_space<vmem>>, vector<32x1xf32>
    %37 = vector.broadcast %36 : vector<32x1xf32> to vector<32x128xf32>
    %38 = arith.addf %35, %37 : vector<32x128xf32>
    %cst_5 = arith.constant 0.000000e+00 : f32
    %39 = vector.broadcast %cst_5 : f32 to vector<32x128xf32>
    %40 = arith.maximumf %38, %39 : vector<32x128xf32>
    %c0_6 = arith.constant 0 : index
    %c0_7 = arith.constant 0 : index
    %41 = vector.load %arg4[%c0_6, %c0_7] : memref<4x32xf32, #tpu.memory_space<vmem>>, vector<4x32xf32>
    %cst_8 = arith.constant dense<0.000000e+00> : vector<4x128xf32>
    %42 = tpu.matmul %41, %40, %cst_8 {dimension_numbers = #tpu.dot_dimension_numbers<[1], [0], [0], [1], [0, 0, 1, 1], [], []>} : vector<4x32xf32>, vector<32x128xf32>, vector<4x128xf32> -> vector<4x128xf32>
    %c0_9 = arith.constant 0 : index
    %c0_10 = arith.constant 0 : index
    %43 = vector.load %arg5[%c0_9, %c0_10] : memref<4x1xf32, #tpu.memory_space<vmem>>, vector<4x1xf32>
    %44 = vector.broadcast %43 : vector<4x1xf32> to vector<4x128xf32>
    %45 = arith.addf %42, %44 : vector<4x128xf32>
    %c0_11 = arith.constant 0 : index
    %c0_12 = arith.constant 0 : index
    %46 = vector.load %arg6[%c0_11, %c0_12] : memref<4x128xf32, #tpu.memory_space<vmem>>, vector<4x128xf32>
    tpu.vector_store %arg6[%c0_11, %c0_12], %45 {strides = array<i32>} : memref<4x128xf32, #tpu.memory_space<vmem>>, vector<4x128xf32>,
    return
  }
  func.func @transform_0(%arg0: i32) -> (i32, i32) {
    %c0_i32 = arith.constant 0 : i32
    %c0_i32_0 = arith.constant 0 : i32
    return %c0_i32, %arg0 : i32, i32
  }
  func.func @transform_1(%arg0: i32) -> (i32, i32) {
    %c0_i32 = arith.constant 0 : i32
    %c0_i32_0 = arith.constant 0 : i32
    %c0_i32_1 = arith.constant 0 : i32
    return %c0_i32, %c0_i32_0 : i32, i32
  }
  func.func @transform_2(%arg0: i32) -> (i32, i32) {
    %c0_i32 = arith.constant 0 : i32
    %c0_i32_0 = arith.constant 0 : i32
    %c0_i32_1 = arith.constant 0 : i32
    return %c0_i32, %c0_i32_0 : i32, i32
  }
  func.func @transform_3(%arg0: i32) -> (i32, i32) {
    %c0_i32 = arith.constant 0 : i32
    %c0_i32_0 = arith.constant 0 : i32
    %c0_i32_1 = arith.constant 0 : i32
    return %c0_i32, %c0_i32_0 : i32, i32
  }
  func.func @transform_4(%arg0: i32) -> (i32, i32) {
    %c0_i32 = arith.constant 0 : i32
    %c0_i32_0 = arith.constant 0 : i32
    %c0_i32_1 = arith.constant 0 : i32
    return %c0_i32, %c0_i32_0 : i32, i32
  }
  func.func @transform_5(%arg0: i32) -> (i32, i32) {
    %c0_i32 = arith.constant 0 : i32
    %c0_i32_0 = arith.constant 0 : i32
    return %c0_i32, %arg0 : i32, i32
  }
}

</mosaic_0001>

<bundles_post_ra>
// kernel: tpu_custom_call.1
= control target key start
LH: loop header
LB: loop body
LE: loop exit
PB: predicated region body
PF: predicated region fallthrough
CT: control target
= control target key end

     0   :  { %10 = vsyncpa [#allocation3], 0  ;;  %s1209_s0 = inlined_call_operand.hbm [shape: s32[6,256], index: 0, kind: input, shape index: {}]   ;;  %s1210_s1 = inlined_call_operand.vmem [shape: f32[32,40], index: 1, kind: input, shape index: {}]   ;;  %s1211_s2 = inlined_call_operand.vmem [shape: f32[32,1], index: 2, kind: input, shape index: {}]   ;;  %s1212_s3 = inlined_call_operand.vmem [shape: f32[4,32], index: 3, kind: input, shape index: {}]   ;;  %s1213_s4 = inlined_call_operand.vmem [shape: f32[4,1], index: 4, kind: input, shape index: {}]   ;;  %s1214_s5 = inlined_call_operand.hbm [shape: f32[4,256], index: 5, kind: output, shape index: {}]  }
   0x1   :  { %12 = vsyncpa [#allocation3 + $0x1], 0 }
   0x2   :  { %13 = vsyncpa [#allocation4], 0 }
   0x3   :  { %15 = vsyncpa [#allocation4 + $0x1], 0  ;;  %s915_s18 = smov 0   ;;  %s917_s19 = smov 0  }
   0x4   :  { %s919_s20 = smov 0   ;;  %s921_s21 = smov 0  }
   0x5 LB: > { %s936_s22 = sadd.s32 4294967295, %s877_s21   ;;  %s657_s23 = sadd.s32 4294967294, %s877_s21   ;;  %s877_s21 = sphi %s921_s21, %s1229_s21   ;;  %s873_s20 = sphi %s919_s20, %s1228_s20   ;;  %s869_s19 = sphi %s917_s19, %s1227_s19   ;;  %s865_s18 = sphi %s915_s18, %s1226_s18  }
   0x6   : > { %s940_s24 = sadd.s32 1, %s877_s21   ;;  %s28_s25 = sadd.s32 1, %s873_s20 }
   0x7   : > { %s25_s26 = ssub.s32 %s877_s21, %s940_s24  ;;  %p35_p0 = scmp.ne.s32.totalorder %s873_s20, %s869_s19 }
   0x8   : > { %p26_p1 = scmp.eq.s32.totalorder %s25_s26, 0  ;;  %p36_p2 = scmp.eq.s32.totalorder %s877_s21, 0 }
   0x9   : > { %p41_p3 = scmp.ne.s32.totalorder %s869_s19, %s865_s18  ;;  %p42_p4 = scmp.eq.s32.totalorder %s936_s22, 0 }
   0xa   : > { %s952_s27 = scalar_select %p26_p1, %s873_s20, %s28_s25  }
   0xb   : > { %p954_p5 = por %p36_p2, %p35_p0  ;;  %p958_p6 = por %p42_p4, %p41_p3 }
   0xc   : > { %p149_p7 = scmp.eq.s32.totalorder %s936_s22, 1  ;;  %p155_p8 = scmp.eq.s32.totalorder %s657_s23, 1 }
   0xd   : > { %p741_p10 = scmp.lt.s32.totalorder %s877_s21, 2  ;;  %s187_s7 = sand.u32 1, %s873_s20  }
   0xe   : > { %p965_p11 = por %p149_p7, %p35_p0  ;;  %p969_p12 = por %p155_p8, %p41_p3 }
   0xf   : > { %s661_s8 = sshll.u32 %s877_s21, 7  ;;  %s660_s9 = sshll.u32 %s187_s7, 3 }
  0x10   : > { %s1218_s30 = scalar_select %p965_p11, 1, 0 }
  0x11   : > { %s1219_s6 = scalar_select %p969_p12, 1, 0 }
  0x12   : > { %s978_s12 = scalar_lea.hbm %s1209_s0, %s661_s8  ;;  %s191_s13 = scalar_lea.vmem [#allocation2], %s660_s9 }
  0x13   : > { %s198_s14 = sshll.u32 %s191_s13, 4  ;;  %p982_p13 = pnand %p741_p10, %p954_p5  ;;  %s986_s14 = int_to_ptr.vmem [resolvable:$true] %s198_s14 }
  0x14   : > { %s188_s16 = scalar_lea.sflag [#allocation3], %s187_s7  ;;  %s781_s17 = scalar_lea.hbm %s978_s12, 128 }
  0x15   : > { %p782_p2 = scmp.ne.s32.totalorder %s978_s12, %s781_s17  ;;  %p783_p3 = pneg %p982_p13 }
  0x16   : > { %s786_s26 = scalar_lea.hbm %s1209_s0, 256  ;;  %p787_p5 = scmp.lt.u32.totalorder %s978_s12, %s1209_s0 }
  0x17   : > { %p784_p4 = pnand %p783_p3, %p782_p2  ;;  %p788_p8 = scmp.lt.u32.totalorder %s786_s26, %s781_s17 }
  0x18   : > { %p790_p9 = scmp.lt.u32.totalorder %s781_s17, %s978_s12 }
  0x19   : > { %p785_p7 = pneg %p784_p4  ;;  %p789_p10 = por %p788_p8, %p787_p5 }
  0x1b   : > { %p791_p0 = por %p790_p9, %p789_p10 }
  0x1d   : > { %p792_p1 = pnand %p791_p0, %p785_p7 }
  0x1f   : > { %795 = shalt.err (!%p792_p1)
}
  0x20   : > { %s796_s7 = scalar_lea.vmem %s986_s14, 128  ;;  %s879_s9 = smov [#allocation2]  }
  0x21   : > { %p797_p2 = scmp.ne.s32.totalorder %s986_s14, %s796_s7  ;;  %s801_s10 = sshll.u32 %s879_s9, 4  ;;  %s802_s10 = int_to_ptr.vmem [resolvable:$false] %s801_s10 }
  0x22   : > { %s803_s11 = scalar_lea.vmem %s802_s10, 256  ;;  %p804_p11 = scmp.lt.s32.totalorder %s986_s14, %s802_s10 }
  0x23   : > { %p799_p4 = pnand %p797_p2, %p783_p3  ;;  %p805_p5 = scmp.lt.s32.totalorder %s803_s11, %s796_s7 }
  0x25   : > { %p800_p12 = pneg %p799_p4  ;;  %p806_p8 = por %p805_p5, %p804_p11 }
  0x27   : > { %p807_p9 = pnand %p806_p8, %p800_p12 }
  0x29   : > { %810 = shalt.err (!%p807_p9)
}
  0x2a   : > { %736 = dma.hbm_to_vmem [thread:$0]  (!%p982_p13), %s978_s12, 128, %s986_s14, %s188_s16  }
  0x2b   : > { %p1221_p0 = scmp.lt.s32.totalorder %s877_s21, 3  ;;  %p1222_p1 = scmp.ge.s32.totalorder %s877_s21, 1 }
  0x2d   : > { %p204_p3 = pnand %p1222_p1, %p1221_p0 }
  0x2e   : > { %s1020_s13 = sand.u32 (!%p204_p3), 1, %s869_s19  }
  0x2f   : > { %207 = sbr.rel (%p204_p3) target bundleno = 550 (0x226), region = 40  ;;  %s663_s17 = sshll.u32 (!%p204_p3), %s1020_s13, 3 }
  0x30   : > { %s210_s23 = scalar_lea.sflag (!%p204_p3), [#allocation3], %s1020_s13  ;;  %s213_s25 = scalar_lea.vmem (!%p204_p3), [#allocation2], %s663_s17 }
  0x36   : > { %856 = dma.done.wait (%p958_p6), %s210_s23, 128  }
  0x37   : > { %858 = vsyncadd (%p958_p6), %s210_s23, 4294967168  ;;  %v241_v0 = vlaneseq  ;;  %v880_v1 = vmov 0   ;;  %vm389_vm0 = vcmask 326656   ;;  %v240_v10 = vld [vmem:[%s213_s25] sm:$0x3f]  ;;  %v367_v22 = vld [vmem:[%s1211_s2 + $0x10] sm:$0xff] }
  0x38   : > { %779 = vset.pattern.permute.xlu0 %v880_v1  ;;  %780 = vset.pattern.permute.xlu1 %v880_v1  ;;  %v361_v12 = vld [vmem:[%s1210_s1] sm:$0xff]  ;;  %v366_v23 = vld [vmem:[%s1211_s2 + $0x8] sm:$0xff]  ;;  %v368_v28 = vld [vmem:[%s1211_s2 + $0x18] sm:$0xff]  ;;  %s664_s26 = sshll.u32 %s1020_s13, 2  ;;  %s671_s28 = sshll.u32 %s936_s22, 6 }
  0x39   : > { %v242_v2 = vshrl.u32 %v241_v0, 7  ;;  %698 = vmatprep.mubr.msk.f32.mxu0 %vm389_vm0, %v361_v12  ;;  %v365_v17 = vld [vmem:[%s1211_s2] sm:$0xff]  ;;  %381 = vperm.xlu1 %780, %v367_v22   ;;  %s239_s8 = scalar_lea.vmem [#allocation5], %s664_s26  ;;  %s1165_s11 = scalar_lea.hbm %s1214_s5, %s671_s28 }
  0x3a   : > { %371 = vperm.xlu0 %779, %v365_v17   ;;  %v492_v37 = vld [vmem:[%s1213_s4] sm:$0xf]  ;;  %s587_s7 = sshll.u32 %s239_s8, 4  ;;  %s574_s17 = scalar_lea.sflag [#allocation4], %s1020_s13  ;;  %s1167_s7 = int_to_ptr.vmem [resolvable:$true] %s587_s7 }
  0x3b   : > { %v249_v3 = vsub.s32 0, %v242_v2  ;;  %v263_v4 = vsub.s32 1, %v242_v2  ;;  %v282_v5 = vsub.s32 2, %v242_v2  ;;  %v301_v6 = vsub.s32 3, %v242_v2  ;;  %s811_s23 = scalar_lea.vmem %s1167_s7, 64  ;;  %p1223_p11 = scmp.ne.s32.totalorder %s1218_s30, 0 }
  0x3c   : > { %v320_v7 = vsub.s32 4, %v242_v2  ;;  %v339_v8 = vsub.s32 5, %v242_v2  ;;  %v243_v9 = vadd.s32 8, %v242_v2  ;;  %v1030_v11 = vadd.s32 16, %v242_v2  ;;  %p812_p6 = scmp.ne.s32.totalorder %s1167_s7, %s811_s23  ;;  %s884_s22 = smov [#allocation5]  }
  0x3d   : > { %v1035_v13 = vrot.slane %v240_v10, %v249_v3  ;;  %v1037_v14 = vrot.slane %v240_v10, %v263_v4  ;;  %v1039_v15 = vrot.slane %v240_v10, %v282_v5  ;;  %v1041_v16 = vadd.s32 24, %v242_v2  ;;  %386 = vperm.xlu1 %780, %v368_v28   ;;  %s815_s25 = sshll.u32 %s884_s22, 4  ;;  %s816_s25 = int_to_ptr.vmem [resolvable:$false] %s815_s25 }
  0x3e   : > { %v1047_v18 = vrot.slane %v240_v10, %v301_v6  ;;  %v1049_v19 = vrot.slane %v240_v10, %v320_v7  ;;  %v1051_v20 = vrot.slane %v240_v10, %v339_v8  ;;  %v1053_v21 = vadd.s32 32, %v242_v2  ;;  %376 = vperm.xlu0 %779, %v366_v23   ;;  %p813_p12 = pnand %p812_p6, %p1223_p11  ;;  %s817_s29 = scalar_lea.vmem %s816_s25, 128 }
  0x3f   : > { %vm251_vm1 = vcmp.eq.s32.totalorder %v1035_v13, %v242_v2  ;;  %vm252_vm2 = vcmp.eq.s32.totalorder %v1035_v13, %v243_v9  ;;  %vm265_vm3 = vcmp.eq.s32.totalorder %v1037_v14, %v242_v2  ;;  %vm266_vm4 = vcmp.eq.s32.totalorder %v1037_v14, %v243_v9  ;;  %p818_p7 = scmp.lt.s32.totalorder %s1167_s7, %s816_s25  ;;  %p819_p10 = scmp.lt.s32.totalorder %s817_s29, %s811_s23 }
  0x40   : > { %v256_v24 = vsel %vm251_vm1, 1, %v880_v1  ;;  %v257_v25 = vsel %vm252_vm2, 1, %v880_v1  ;;  %v270_v26 = vsel %vm265_vm3, 1, %v880_v1  ;;  %v271_v27 = vsel %vm266_vm4, 1, %v880_v1  ;;  %p814_p13 = pneg %p813_p12 }
  0x41   : > { %v275_v29 = vadd.s32 %v270_v26, %v256_v24  ;;  %v276_v30 = vadd.s32 %v271_v27, %v257_v25  ;;  %vm284_vm5 = vcmp.eq.s32.totalorder %v1039_v15, %v242_v2  ;;  %vm285_vm6 = vcmp.eq.s32.totalorder %v1039_v15, %v243_v9  ;;  %v362_v27 = vld [vmem:[%s1210_s1 + $0x8] sm:$0xff]  ;;  %p820_p2 = por %p819_p10, %p818_p7 }
  0x42   : > { %v289_v31 = vsel %vm284_vm5, 1, %v880_v1  ;;  %v290_v32 = vsel %vm285_vm6, 1, %v880_v1  ;;  %vm303_vm7 = vcmp.eq.s32.totalorder %v1047_v18, %v242_v2  ;;  %vm304_vm8 = vcmp.eq.s32.totalorder %v1047_v18, %v243_v9  ;;  %495 = vperm.xlu0 %779, %v492_v37  }
  0x43   : > { %v294_v33 = vadd.s32 %v289_v31, %v275_v29  ;;  %v295_v34 = vadd.s32 %v290_v32, %v276_v30  ;;  %v308_v35 = vsel %vm303_vm7, 1, %v880_v1  ;;  %v309_v36 = vsel %vm304_vm8, 1, %v880_v1  ;;  %p821_p4 = pnand %p820_p2, %p814_p13 }
  0x44   : > { %vm322_vm9 = vcmp.eq.s32.totalorder %v1049_v19, %v242_v2  ;;  %vm323_vm10 = vcmp.eq.s32.totalorder %v1049_v19, %v243_v9  ;;  %vm341_vm11 = vcmp.eq.s32.totalorder %v1051_v20, %v242_v2  ;;  %vm342_vm12 = vcmp.eq.s32.totalorder %v1051_v20, %v243_v9 }
  0x45   : > { %v313_v38 = vadd.s32 %v308_v35, %v294_v33  ;;  %v314_v39 = vadd.s32 %v309_v36, %v295_v34  ;;  %v327_v40 = vsel %vm322_vm9, 1, %v880_v1  ;;  %v328_v41 = vsel %vm323_vm10, 1, %v880_v1 }
  0x46   : > { %v346_v42 = vsel %vm341_vm11, 1, %v880_v1  ;;  %v347_v43 = vsel %vm342_vm12, 1, %v880_v1  ;;  %vm253_vm13 = vcmp.eq.s32.totalorder %v1035_v13, %v1030_v11  ;;  %vm254_vm14 = vcmp.eq.s32.totalorder %v1035_v13, %v1041_v16 }
  0x47   : > { %v332_v44 = vadd.s32 %v327_v40, %v313_v38  ;;  %v333_v45 = vadd.s32 %v328_v41, %v314_v39  ;;  %v258_v46 = vsel %vm253_vm13, 1, %v880_v1  ;;  %v259_v47 = vsel %vm254_vm14, 1, %v880_v1 }
  0x48   : > { %vm267_vm15 = vcmp.eq.s32.totalorder %v1037_v14, %v1030_v11  ;;  %vm268_vm1 = vcmp.eq.s32.totalorder %v1037_v14, %v1041_v16  ;;  %vm286_vm2 = vcmp.eq.s32.totalorder %v1039_v15, %v1030_v11  ;;  %vm287_vm3 = vcmp.eq.s32.totalorder %v1039_v15, %v1041_v16 }
  0x49   : > { %v351_v48 = vadd.s32 %v346_v42, %v332_v44  ;;  %v352_v49 = vadd.s32 %v347_v43, %v333_v45  ;;  %v272_v50 = vsel %vm267_vm15, 1, %v880_v1  ;;  %v273_v51 = vsel %vm268_vm1, 1, %v880_v1 }
  0x4a   : > { %v277_v52 = vadd.s32 %v272_v50, %v258_v46  ;;  %v278_v53 = vadd.s32 %v273_v51, %v259_v47  ;;  %v291_v54 = vsel %vm286_vm2, 1, %v880_v1  ;;  %v292_v55 = vsel %vm287_vm3, 1, %v880_v1  ;;  %v491_v47 = vld [vmem:[%s1212_s3] sm:$0xf] }
  0x4b   : > { %v356_v56 = vcvt.s32.f32 %v351_v48  ;;  %v357_v57 = vcvt.s32.f32 %v352_v49  ;;  %vm305_vm4 = vcmp.eq.s32.totalorder %v1047_v18, %v1030_v11  ;;  %vm306_vm5 = vcmp.eq.s32.totalorder %v1047_v18, %v1041_v16 }
  0x4c   : > { %v296_v58 = vadd.s32 %v291_v54, %v277_v52  ;;  %v297_v59 = vadd.s32 %v292_v55, %v278_v53  ;;  %v310_v60 = vsel %vm305_vm4, 1, %v880_v1  ;;  %v311_v61 = vsel %vm306_vm5, 1, %v880_v1 }
  0x4d   : > { %v715_v62 = vpack.c.bf16 %v357_v57, %v356_v56  ;;  %vm324_vm6 = vcmp.eq.s32.totalorder %v1049_v19, %v1030_v11  ;;  %vm325_vm7 = vcmp.eq.s32.totalorder %v1049_v19, %v1041_v16  ;;  %vm343_vm8 = vcmp.eq.s32.totalorder %v1051_v20, %v1030_v11 }
  0x4e   : > { %v315_v63 = vadd.s32 %v310_v60, %v296_v58  ;;  %v316_v0 = vadd.s32 %v311_v61, %v297_v59  ;;  %v329_v2 = vsel %vm324_vm6, 1, %v880_v1  ;;  %v330_v3 = vsel %vm325_vm7, 1, %v880_v1 }
  0x4f   : > { %716 = vmatprep.subr.bf16.mxu0 %v715_v62  ;;  %vm344_vm9 = vcmp.eq.s32.totalorder %v1051_v20, %v1041_v16  ;;  %v348_v4 = vsel %vm343_vm8, 1, %v880_v1  ;;  %vm255_vm10 = vcmp.eq.s32.totalorder %v1035_v13, %v1053_v21  ;;  %vm269_vm11 = vcmp.eq.s32.totalorder %v1037_v14, %v1053_v21 }
  0x50   : > { %718 = vmatpush3.bf16.msra.mxu0 %v715_v62  ;;  %v334_v5 = vadd.s32 %v329_v2, %v315_v63  ;;  %v335_v6 = vadd.s32 %v330_v3, %v316_v0  ;;  %v349_v7 = vsel %vm344_vm9, 1, %v880_v1  ;;  %v260_v8 = vsel %vm255_vm10, 1, %v880_v1 }
  0x51   : > { %v274_v9 = vsel %vm269_vm11, 1, %v880_v1  ;;  %vm288_vm12 = vcmp.eq.s32.totalorder %v1039_v15, %v1053_v21  ;;  %vm307_vm13 = vcmp.eq.s32.totalorder %v1047_v18, %v1053_v21  ;;  %vm326_vm14 = vcmp.eq.s32.totalorder %v1049_v19, %v1053_v21 }
  0x52   : > { %v353_v10 = vadd.s32 %v348_v4, %v334_v5  ;;  %v354_v11 = vadd.s32 %v349_v7, %v335_v6  ;;  %v279_v12 = vadd.s32 %v274_v9, %v260_v8  ;;  %v293_v13 = vsel %vm288_vm12, 1, %v880_v1 }
  0x53   : > { %v312_v14 = vsel %vm307_vm13, 1, %v880_v1  ;;  %vm345_vm15 = vcmp.eq.s32.totalorder %v1051_v20, %v1053_v21  ;;  %v331_v15 = vsel %vm326_vm14, 1, %v880_v1  ;;  %v363_v20 = vld [vmem:[%s1210_s1 + $0x10] sm:$0xff]  ;;  %v881_v21 = vmov 0.0|0.0  }
  0x54   : > { %v358_v16 = vcvt.s32.f32 %v353_v10  ;;  %v359_v17 = vcvt.s32.f32 %v354_v11  ;;  %v298_v22 = vadd.s32 %v293_v13, %v279_v12  ;;  %v350_v24 = vsel %vm345_vm15, 1, %v880_v1  ;;  %v364_v1 = vld [vmem:[%s1210_s1 + $0x18] sm:$0xff]  ;;  %723 = vmatprep.subr.bf16.mxu1 %v881_v21 }
  0x55   : > { %vm882_vm1 = vmmov 0   ;;  %v883_v28 = vmov 0.0  }
  0x56   : > { %v719_v23 = vpack.c.bf16 %v359_v17, %v358_v16  ;;  %v317_v18 = vadd.s32 %v312_v14, %v298_v22  ;;  %712 = vmatprep.mubr.msk.f32.mxu1 %vm882_vm1, %v883_v28 }
  0x58   : > { %720 = vmatprep.subr.bf16.mxu0 %v719_v23  ;;  %v336_v19 = vadd.s32 %v331_v15, %v317_v18 }
  0x59   : > { %722 = vmatpush3.bf16.msra.mxu0 %v719_v23 }
  0x5a   : > { %v355_v25 = vadd.s32 %v350_v24, %v336_v19 }
  0x5c   : > { %v360_v26 = vcvt.s32.f32 %v355_v25 }
  0x5e   : > { %696 = vmatprep.subr.mxu0 %v360_v26 }
  0x5f   : > { %697 = vmatpush3.msra.mxu0 %v360_v26 }
  0x60   : > { %699 = vmatmul.mubr.msk.f32.vlgmr.msra.gmra.mrb[0].mxu0 %vm389_vm0, %v362_v27 }
  0x61   : > { %701 = vmatprep.mubr.msk.f32.mxu0 %vm389_vm0, %v363_v20 }
  0x64   : > { %702 = vmatmul.mubr.msk.f32.gmra.mrb[2].mxu0 %vm389_vm0, %v364_v1  ;;  %vm498_vm0 = vcmask 261120  }
  0xb8   : > { %v382_v30 = vpop.permute.xlu1 %381 }
  0xb9   : > { %v372_v29 = vpop.permute.xlu0 %371 }
  0xbc   : > { %v387_v37 = vpop.permute.xlu1 %386 }
  0xbd   : > { %v377_v31 = vpop.permute.xlu0 %376 }
  0xc1   : > { %v496_v48 = vpop.permute.xlu0 %495 }
 0x133   : > { %v700_v32 = vpop.f32.mrb[0].mxu0 }
 0x134   : > { %v474_v33 = vadd.f32 %v700_v32, %v377_v31  ;;  %v468_v34 = vpop.f32.mrb[1].mxu0 }
 0x135   : > { %v469_v35 = vadd.f32 %v468_v34, %v372_v29 }
 0x136   : > { %v488_v36 = vmax.f32 %v474_v33, 0.0 }
 0x137   : > { %v487_v38 = vmax.f32 %v469_v35, 0.0  ;;  %v703_v39 = vpop.f32.mrb[2].mxu0 }
 0x138   : > { %v484_v40 = vadd.f32 %v703_v39, %v387_v37  ;;  %v478_v41 = vpop.f32.mrb[3].mxu0 }
 0x139   : > { %v479_v42 = vadd.f32 %v478_v41, %v382_v30  ;;  %v724_v43 = vpack.c.bf16 %v488_v36, %v487_v38 }
 0x13a   : > { %v490_v44 = vmax.f32 %v484_v40, 0.0 }
 0x13b   : > { %v489_v45 = vmax.f32 %v479_v42, 0.0  ;;  %725 = vmatpush3.bf16.msra.mxu1 %v724_v43 }
 0x13c   : > { %726 = vmatprep.subr.bf16.mxu1 %v881_v21 }
 0x13d   : > { %v727_v46 = vpack.c.bf16 %v490_v44, %v489_v45 }
 0x13f   : > { %728 = vmatpush3.bf16.msra.mxu1 %v727_v46 }
 0x142   : > { %713 = vmatmul.mubr.msk.f32.vlgmr.msra.gmra.mrb[0].mxu1 %vm498_vm0, %v491_v47 }
 0x215   : > { %v568_v49 = vpop.f32.mrb[0].mxu1 }
 0x216   : > { %v569_v50 = vadd.f32 %v568_v49, %v496_v48  ;;  %v714_v51 = vpop.f32.mrb[1].mxu1 }
 0x218   : > { %572 = vst [vmem:[%s239_s8] sm:$0xf] %v569_v50 }
 0x219   : > { %824 = shalt.err (!%p821_p4)
}
 0x21a   : > { %s825_s13 = scalar_lea.hbm %s1165_s11, 64  ;;  %s829_s15 = scalar_lea.hbm %s1214_s5, 128 }
 0x21b   : > { %p826_p5 = scmp.ne.s32.totalorder %s1165_s11, %s825_s13  ;;  %p830_p0 = scmp.lt.u32.totalorder %s1165_s11, %s1214_s5 }
 0x21c   : > { %p831_p1 = scmp.lt.u32.totalorder %s829_s15, %s825_s13  ;;  %p833_p6 = scmp.lt.u32.totalorder %s825_s13, %s1165_s11 }
 0x21d   : > { %p827_p8 = pnand %p826_p5, %p1223_p11 }
 0x21e   : > { %p832_p3 = por %p831_p1, %p830_p0 }
 0x21f   : > { %p828_p9 = pneg %p827_p8 }
 0x220   : > { %p834_p12 = por %p833_p6, %p832_p3 }
 0x222   : > { %p835_p13 = pnand %p834_p12, %p828_p9 }
 0x224   : > { %838 = shalt.err (!%p835_p13)
}
 0x225   : > { %731 = dma.vmem_to_hbm [thread:$0]  (%p1223_p11), %s1167_s7, 64, %s1165_s11, %s574_s17  }
 0x226 PF: > { %s599_s28 = sand.u32 1, %s865_s18   ;;  %p1224_p7 = scmp.ne.s32.totalorder %s1219_s6, 0 }
 0x227   : > { %p1225_p10 = scmp.ge.s32.totalorder %s877_s21, 2  ;;  %s600_s8 = scalar_lea.sflag [#allocation4], %s599_s28 }
 0x229   : > { %p738_p2 = pnand %p1225_p10, %p1224_p7 }
 0x22b   : > { %860 = dma.done.wait (!%p738_p2), %s600_s8, 64  }
 0x22c   : > { %862 = vsyncadd (!%p738_p2), %s600_s8, 4294967232  ;;  %p18_p4 = scmp.ge.s32.totalorder %s940_s24, 4   ;;  %s1226_s18 = smov %s869_s19 }
 0x22d   : > { %s1227_s19 = smov %s873_s20  ;;  %s1228_s20 = smov %s952_s27 }
 0x22e   : > { %s1229_s21 = smov %s940_s24  ;;  %20 = sbr.rel (!%p18_p4) target bundleno = 5 (0x5), region = 85 }
 0x235   :  { %605 = vsyncpa [#allocation3], 1 }
 0x236   :  { %607 = vsyncpa [#allocation3 + $0x1], 1 }
 0x237   :  { %608 = vsyncpa [#allocation4], 1 }
 0x238   :  { %610 = vsyncpa [#allocation4 + $0x1], 1 }

</bundles_post_ra>
